<compile_context>
chip_gen: v7x
topology: tpu7x:2x2x1
jax: 0.10.0
libtpu: 0.0.40
codegen_flags: <defaults>
</compile_context>

<pallas_src>
import functools

import jax
import jax.numpy as jnp
from jax.experimental import pallas as pl
from jax.experimental.pallas import tpu as pltpu

_NEG_FILL = -1e30  # value used by the PyTorch module for masked_fill_


# ----------------------------------------------------------------------------- kernels

def _shared_seq_kernel(x_ref, mask_ref, w_ref, out_ref, *, mxu_dtype):
    # Short-sequence path: one tile per batch element, x passed ONCE (queries == keys).
    # x_ref:    (1, L, D)   mask_ref: (1, L, 1) int32 (1 = padding)
    # w_ref:    (D, D)      W_l^T (so x @ w_ref == Linear(x), no bias)
    # out_ref:  (1, L, D)
    x = x_ref[0]
    xc = x.astype(mxu_dtype)                                   # bf16 MXU operands
    w = w_ref[...].astype(mxu_dtype)

    xw = jnp.dot(xc, w, preferred_element_type=jnp.float32)    # (L, D)  MXU, f32 acc
    s = jax.lax.dot_general(xw.astype(mxu_dtype), xc,
                            (((1,), (1,)), ((), ())),
                            preferred_element_type=jnp.float32)            # (L, L)  MXU

    # masked_fill_ on QUERY rows (module semantics: padded keys still get weight).
    s = jnp.where(mask_ref[0] != 0, _NEG_FILL, s)

    # Row softmax over keys; elementwise math stays f32.
    m = jnp.max(s, axis=-1, keepdims=True)
    e = jnp.exp(s - m)
    l = jnp.sum(e, axis=-1, keepdims=True)

    num = jnp.dot(e.astype(mxu_dtype), xc, preferred_element_type=jnp.float32)  # (L, D)
    # Fold 1/l into the (L, D) output instead of scaling the (L, L) probabilities;
    # exact divide on (L, 1) values is negligible (and avoids approx-reciprocal error).
    out_ref[0] = (num * (1.0 / l)).astype(out_ref.dtype)


def _flash_kernel(xq_ref, xs_ref, mask_ref, w_ref, out_ref,
                  xw_s, m_s, l_s, acc_s, *, seq_len, mxu_dtype):
    # Tiled path, grid (batch, query-tiles, key-tiles); key axis innermost ("arbitrary").
    # xq_ref: (1, TQ, D)  xs_ref: (1, TK, D) (TK divides L)  mask_ref: (1, TQ, 1) int32
    # w_ref:  (D, D)      out_ref: (1, TQ, D) (written on the last key tile)
    # xw_s:   (TQ, D)     cached W-projected queries (computed once per (b, q))
    # m_s/l_s:(TQ, 1) f32 online-softmax running max / denominator
    # acc_s:  (TQ, D) f32 unnormalized output accumulator
    q = pl.program_id(1)
    k = pl.program_id(2)

    @pl.when(k == 0)
    def _init():
        xq = xq_ref[0].astype(mxu_dtype)
        xw = jnp.dot(xq, w_ref[...].astype(mxu_dtype),
                     preferred_element_type=jnp.float32)
        xw_s[...] = xw.astype(xw_s.dtype)
        m_s[...] = jnp.full_like(m_s, _NEG_FILL)
        l_s[...] = jnp.zeros_like(l_s)
        acc_s[...] = jnp.zeros_like(acc_s)

    xs = xs_ref[0].astype(mxu_dtype)                                    # (TK, D)
    s = jax.lax.dot_general(xw_s[...], xs, (((1,), (1,)), ((), ())),
                            preferred_element_type=jnp.float32)         # (TQ, TK)  MXU

    # Query-row mask (module semantics) + partial tail rows of the cdiv query grid.
    tq = s.shape[0]
    row = q * tq + jax.lax.broadcasted_iota(jnp.int32, (tq, 1), 0)
    fill = (mask_ref[0] != 0) | (row >= seq_len)
    s = jnp.where(fill, _NEG_FILL, s)

    # Online softmax (f32 elementwise math).
    m_prev = m_s[...]
    m_new = jnp.maximum(m_prev, jnp.max(s, axis=-1, keepdims=True))
    corr = jnp.exp(m_prev - m_new)
    e = jnp.exp(s - m_new)
    l_s[...] = corr * l_s[...] + jnp.sum(e, axis=-1, keepdims=True)
    acc_s[...] = corr * acc_s[...] + jnp.dot(e.astype(mxu_dtype), xs,
                                             preferred_element_type=jnp.float32)
    m_s[...] = m_new

    @pl.when(k == pl.num_programs(2) - 1)
    def _finalize():
        out_ref[0] = (acc_s[...] * (1.0 / l_s[...])).astype(out_ref.dtype)


# ----------------------------------------------------------------------------- wrapper

def _vmem_limit(need_bytes):
    need = int(need_bytes * 1.5) + (1 << 20)                  # headroom
    return max(32 * 1024 * 1024, min(need, 64 * 1024 * 1024))  # stay within v7x physical


def bilinear_self_attn(x, x_mask, w_l, *, tq=None, tk=None,
                       mxu_dtype=jnp.bfloat16, out_dtype=None):
    """x: (B, L, D) f32 BiRNN output (D = 2*hidden); x_mask: (B, L), 1/True = padding;
    w_l: (D, D) PyTorch Linear weight (out, in), no bias.  Returns (x, x_h)."""
    B, L, D = x.shape
    out_dtype = x.dtype if out_dtype is None else out_dtype

    w_t = jnp.transpose(w_l)                          # kernel computes x @ W_l^T
    mask_i32 = x_mask.astype(jnp.int32)[:, :, None]   # (B, L, 1), tiny vs x

    # ---- query tile -------------------------------------------------------------
    if tq is None:
        if L <= 256 and (B >= 2 or L <= 128):
            tq = L          # short sequence: one tile, shared Q/K/V path
        elif L <= 256:
            tq = 128        # B == 1: give the second TensorCore (v7x) >= 2 tiles
        else:
            tq = 256        # pass tq=128 explicitly on v5e (4x128 MXU, tighter VMEM)
    tq = min(tq, L)
    if tq < L:
        tq = max(8, (tq // 8) * 8)       # (8, 128) layout rule on the sublane dim

    # ---- key tile (flash path only) ---------------------------------------------
    if tk is None:
        if L <= 1024:
            tk = L                        # keys resident across all query tiles
        else:
            tk = next((c for c in (512, 256, 128) if L % c == 0), L)
            # TODO(synk): lengths with no {512,256,128} divisor fall back to resident
            #             keys; key-tiling such L would need a padded copy of x.
    tk = min(tk, L)
    if tk < L and (L % tk != 0 or tk % 8 != 0):
        raise ValueError(f"tk={tk} must divide L={L} and be a multiple of 8")

    shared = (tq == L) and (tk == L)
    nq = pl.cdiv(L, tq)
    nk = L // tk

    f32b = 4
    outb = jnp.dtype(out_dtype).itemsize
    mxub = jnp.dtype(mxu_dtype).itemsize

    cost = pl.CostEstimate(
        flops=int(2 * B * L * (D * D + 2 * L * D)),
        transcendentals=int(B * L * L),
        bytes_accessed=int((2 * B * L * D + B * L + D * D) * f32b + B * L * D * outb))

    if shared:
        # x is passed ONCE and used as queries, keys and values: halves HBM reads of x
        # in the memory-bound short-sequence regime and frees one (L, D) VMEM buffer.
        blocks = (L * D + L + D * D) * f32b + L * D * outb
        temps = 4 * L * L * f32b + 4 * L * D * f32b
        x_h = pl.pallas_call(
            functools.partial(_shared_seq_kernel, mxu_dtype=mxu_dtype),
            out_shape=jax.ShapeDtypeStruct((B, L, D), out_dtype),
            grid=(B,),
            in_specs=[
                pl.BlockSpec((1, L, D), lambda b: (b, 0, 0)),    # whole sequence
                pl.BlockSpec((1, L, 1), lambda b: (b, 0, 0)),    # row mask
                pl.BlockSpec((D, D), lambda b: (0, 0)),          # W_l^T (resident)
            ],
            out_specs=pl.BlockSpec((1, L, D), lambda b: (b, 0, 0)),
            compiler_params=pltpu.CompilerParams(
                dimension_semantics=("parallel",),
                vmem_limit_bytes=_vmem_limit(2 * blocks + temps)),
            cost_estimate=cost,
        )(x, mask_i32, w_t)
    else:
        # W_l^T (and the keys tile within a batch element) are grid-constant along the
        # inner axes; pipeline_mode=pl.Buffered(1) single-buffering is a further VMEM
        # saving where the JAX version supports it.
        blocks = (tq * D + tk * D + tq + D * D) * f32b + tq * D * outb
        scratch = tq * D * mxub + 2 * tq * f32b + tq * D * f32b
        temps = 4 * tq * tk * f32b + 2 * tq * D * f32b
        x_h = pl.pallas_call(
            functools.partial(_flash_kernel, seq_len=L, mxu_dtype=mxu_dtype),
            out_shape=jax.ShapeDtypeStruct((B, L, D), out_dtype),
            grid=(B, nq, nk),
            in_specs=[
                pl.BlockSpec((1, tq, D), lambda b, q, k: (b, q, 0)),   # query rows
                pl.BlockSpec((1, tk, D), lambda b, q, k: (b, k, 0)),   # key/value tile
                pl.BlockSpec((1, tq, 1), lambda b, q, k: (b, q, 0)),   # query-row mask
                pl.BlockSpec((D, D), lambda b, q, k: (0, 0)),          # W_l^T (resident)
            ],
            out_specs=pl.BlockSpec((1, tq, D), lambda b, q, k: (b, q, 0)),
            scratch_shapes=[
                pltpu.VMEM((tq, D), mxu_dtype),     # cached W-projected queries
                pltpu.VMEM((tq, 1), jnp.float32),   # running max
                pltpu.VMEM((tq, 1), jnp.float32),   # running denominator
                pltpu.VMEM((tq, D), jnp.float32),   # unnormalized accumulator
            ],
            compiler_params=pltpu.CompilerParams(
                dimension_semantics=("parallel", "parallel", "arbitrary"),
                vmem_limit_bytes=_vmem_limit(2 * blocks + scratch + temps)),
            cost_estimate=cost,
        )(x, x, mask_i32, w_t)

    return x, x_h


# ----------------------------------------------------------------------------- references

def _reference_f32(x, x_mask, w_l):
    """Exact f32 forward pass (HIGHEST matmul precision)."""
    hp = jax.lax.Precision.HIGHEST
    xw = jnp.einsum("bld,ed->ble", x, w_l, precision=hp)        # Linear(no bias): x @ W^T
    s = jnp.einsum("ble,bke->blk", xw, x, precision=hp)         # (B, L, L)
    s = jnp.where(x_mask[:, :, None], _NEG_FILL, s)             # query-row mask
    a = jax.nn.softmax(s, axis=-1)
    x_h = jnp.einsum("blk,bkd->bld", a, x, precision=hp)
    return x, x_h


def _reference_matched(x, x_mask, w_l, mxu_dtype):
    """Same math with the kernel's MXU-operand casts (bf16 inputs, f32 accumulation)."""
    xc = x.astype(mxu_dtype)
    wt = jnp.transpose(w_l).astype(mxu_dtype)
    xw = jnp.einsum("bld,de->ble", xc, wt, preferred_element_type=jnp.float32)
    s = jnp.einsum("ble,bke->blk", xw.astype(mxu_dtype), xc,
                   preferred_element_type=jnp.float32)
    s = jnp.where(x_mask[:, :, None], _NEG_FILL, s)
    m = jnp.max(s, axis=-1, keepdims=True)
    e = jnp.exp(s - m)
    l = jnp.sum(e, axis=-1, keepdims=True)
    num = jnp.einsum("blk,bkd->bld", e.astype(mxu_dtype), xc,
                     preferred_element_type=jnp.float32)
    return x, num / l


# ----------------------------------------------------------------------------- test

if __name__ == "__main__":
    key = jax.random.PRNGKey(0)
    kx1, kw1, kx2, kw2 = jax.random.split(key, 4)

    def make_case(k_x, k_w, B, L, hidden, lengths):
        D = 2 * hidden                                           # BiRNN output width
        x = jax.random.normal(k_x, (B, L, D), dtype=jnp.float32)           # RNN output stand-in
        w_l = jax.random.normal(k_w, (D, D), dtype=jnp.float32) * 0.05     # (out, in) layout
        pos = jnp.arange(L, dtype=jnp.int32)[None, :]
        x_mask = pos >= jnp.asarray(lengths, dtype=jnp.int32)[:, None]     # True = padding
        return x, x_mask, w_l

    # Case 1: short sequence -> shared-x path (single tile per batch, x passed once).
    x, x_mask, w_l = make_case(kx1, kw1, B=2, L=8, hidden=16, lengths=[8, 5])
    x_out, x_h = bilinear_self_attn(x, x_mask, w_l)
    x_h = jax.block_until_ready(x_h)
    _, ref_m = _reference_matched(x, x_mask, w_l, jnp.bfloat16)
    _, ref_f = _reference_f32(x, x_mask, w_l)
    assert x_h.shape == x.shape
    assert jnp.array_equal(x_out, x), "case 1: pass-through x mismatch"
    assert jnp.allclose(x_h, ref_m, atol=2e-3, rtol=2e-3), "case 1: mismatch vs matched reference"
    assert jnp.allclose(x_h, ref_f, atol=5e-2, rtol=5e-2), "case 1: mismatch vs f32 reference"

    # Case 2: tiled flash path (query tiles with a partial tail tile + key tiles).
    x, x_mask, w_l = make_case(kx2, kw2, B=2, L=40, hidden=16, lengths=[40, 29])
    x_out, x_h = bilinear_self_attn(x, x_mask, w_l, tq=16, tk=8)
    x_h = jax.block_until_ready(x_h)
    _, ref_m = _reference_matched(x, x_mask, w_l, jnp.bfloat16)
    _, ref_f = _reference_f32(x, x_mask, w_l)
    assert jnp.array_equal(x_out, x), "case 2: pass-through x mismatch"
    assert jnp.allclose(x_h, ref_m, atol=5e-3, rtol=5e-3), "case 2: mismatch vs matched reference"
    assert jnp.allclose(x_h, ref_f, atol=5e-2, rtol=5e-2), "case 2: mismatch vs f32 reference"

    print("KERNEL_OK")
</pallas_src>

<mosaic_0001>
module attributes {stable_mosaic.version = 11 : i64} {
  func.func @_shared_seq_kernel(%arg0: i32, %arg1: memref<1x8x32xf32, #tpu.memory_space<vmem>>, %arg2: memref<1x8x1xi32, #tpu.memory_space<vmem>>, %arg3: memref<32x32xf32, #tpu.memory_space<vmem>>, %arg4: memref<1x8x32xf32, #tpu.memory_space<vmem>>) attributes {dimension_semantics = [#tpu.dimension_semantics<parallel>], iteration_bounds = array<i64: 2>, scalar_prefetch = 0 : i64, scratch_operands = 0 : i64, tpu.core_type = #tpu.core_type<tc>, window_params = [{transform_indices = @transform_0, window_bounds = array<i64: 1, 8, 32>}, {transform_indices = @transform_1, window_bounds = array<i64: 1, 8, 1>}, {pipeline_mode = #tpu.pipeline_mode<synchronous>, transform_indices = @transform_2, window_bounds = array<i64: 32, 32>}, {transform_indices = @transform_3, window_bounds = array<i64: 1, 8, 32>}]} {
    %c0 = arith.constant 0 : index
    %c0_0 = arith.constant 0 : index
    %c0_1 = arith.constant 0 : index
    %0 = vector.load %arg1[%c0, %c0_0, %c0_1] : memref<1x8x32xf32, #tpu.memory_space<vmem>>, vector<1x8x32xf32>
    %1 = vector.shape_cast %0 : vector<1x8x32xf32> to vector<8x32xf32>
    %2 = arith.truncf %1 : vector<8x32xf32> to vector<8x32xbf16>
    %c0_2 = arith.constant 0 : index
    %c0_3 = arith.constant 0 : index
    %3 = vector.load %arg3[%c0_2, %c0_3] : memref<32x32xf32, #tpu.memory_space<vmem>>, vector<32x32xf32>
    %4 = arith.truncf %3 : vector<32x32xf32> to vector<32x32xbf16>
    %cst = arith.constant dense<0.000000e+00> : vector<8x32xf32>
    %5 = tpu.matmul %2, %4, %cst {dimension_numbers = #tpu.dot_dimension_numbers<[1], [0], [0], [1], [0, 0, 1, 1], [], []>} : vector<8x32xbf16>, vector<32x32xbf16>, vector<8x32xf32> -> vector<8x32xf32>
    %6 = arith.truncf %5 : vector<8x32xf32> to vector<8x32xbf16>
    %cst_4 = arith.constant dense<0.000000e+00> : vector<8x8xf32>
    %7 = tpu.matmul %6, %2, %cst_4 {dimension_numbers = #tpu.dot_dimension_numbers<[1], [1], [0], [0], [0, 0, 1, 0], [], []>} : vector<8x32xbf16>, vector<8x32xbf16>, vector<8x8xf32> -> vector<8x8xf32>
    %c0_5 = arith.constant 0 : index
    %c0_6 = arith.constant 0 : index
    %c0_7 = arith.constant 0 : index
    %8 = vector.load %arg2[%c0_5, %c0_6, %c0_7] : memref<1x8x1xi32, #tpu.memory_space<vmem>>, vector<1x8x1xi32>
    %9 = vector.shape_cast %8 : vector<1x8x1xi32> to vector<8x1xi32>
    %c0_i32 = arith.constant 0 : i32
    %10 = vector.broadcast %c0_i32 : i32 to vector<8x1xi32>
    %11 = arith.cmpi ne, %9, %10 : vector<8x1xi32>
    %cst_8 = arith.constant -1.000000e+30 : f32
    %12 = vector.shape_cast %11 : vector<8x1xi1> to vector<8x1xi1>
    %13 = vector.broadcast %12 : vector<8x1xi1> to vector<8x8xi1>
    %14 = vector.broadcast %cst_8 : f32 to vector<8x8xf32>
    %15 = arith.select %13, %14, %7 : vector<8x8xi1>, vector<8x8xf32>
    %cst_9 = arith.constant dense<0xFF800000> : vector<8xf32>
    %16 = vector.multi_reduction <maximumf>, %15, %cst_9 [1] : vector<8x8xf32> to vector<8xf32>
    %17 = vector.shape_cast %16 : vector<8xf32> to vector<8x1xf32>
    %18 = vector.broadcast %17 : vector<8x1xf32> to vector<8x8xf32>
    %19 = arith.subf %15, %18 : vector<8x8xf32>
    %20 = math.exp %19 : vector<8x8xf32>
    %cst_10 = arith.constant dense<0.000000e+00> : vector<8xf32>
    %21 = vector.multi_reduction <add>, %20, %cst_10 [1] : vector<8x8xf32> to vector<8xf32>
    %22 = vector.shape_cast %21 : vector<8xf32> to vector<8x1xf32>
    %23 = arith.truncf %20 : vector<8x8xf32> to vector<8x8xbf16>
    %cst_11 = arith.constant dense<0.000000e+00> : vector<8x32xf32>
    %24 = tpu.matmul %23, %2, %cst_11 {dimension_numbers = #tpu.dot_dimension_numbers<[1], [0], [0], [1], [0, 0, 1, 1], [], []>} : vector<8x8xbf16>, vector<8x32xbf16>, vector<8x32xf32> -> vector<8x32xf32>
    %cst_12 = arith.constant 1.000000e+00 : f32
    %25 = vector.broadcast %cst_12 : f32 to vector<8x1xf32>
    %26 = arith.divf %25, %22 : vector<8x1xf32>
    %27 = vector.broadcast %26 : vector<8x1xf32> to vector<8x32xf32>
    %28 = arith.mulf %24, %27 : vector<8x32xf32>
    %c0_13 = arith.constant 0 : index
    %c0_14 = arith.constant 0 : index
    %c0_15 = arith.constant 0 : index
    %29 = vector.load %arg4[%c0_13, %c0_14, %c0_15] : memref<1x8x32xf32, #tpu.memory_space<vmem>>, vector<1x8x32xf32>
    %30 = vector.shape_cast %29 : vector<1x8x32xf32> to vector<8x32xf32>
    %31 = vector.shape_cast %28 : vector<8x32xf32> to vector<1x8x32xf32>
    tpu.vector_store %arg4[%c0_13, %c0_14, %c0_15], %31 {strides = array<i32>} : memref<1x8x32xf32, #tpu.memory_space<vmem>>, vector<1x8x32xf32>,
    return
  }
  func.func @transform_0(%arg0: i32) -> (i32, i32, i32) {
    %c0_i32 = arith.constant 0 : i32
    %c0_i32_0 = arith.constant 0 : i32
    %c0_i32_1 = arith.constant 0 : i32
    return %arg0, %c0_i32, %c0_i32_0 : i32, i32, i32
  }
  func.func @transform_1(%arg0: i32) -> (i32, i32, i32) {
    %c0_i32 = arith.constant 0 : i32
    %c0_i32_0 = arith.constant 0 : i32
    %c0_i32_1 = arith.constant 0 : i32
    return %arg0, %c0_i32, %c0_i32_0 : i32, i32, i32
  }
  func.func @transform_2(%arg0: i32) -> (i32, i32) {
    %c0_i32 = arith.constant 0 : i32
    %c0_i32_0 = arith.constant 0 : i32
    %c0_i32_1 = arith.constant 0 : i32
    return %c0_i32, %c0_i32_0 : i32, i32
  }
  func.func @transform_3(%arg0: i32) -> (i32, i32, i32) {
    %c0_i32 = arith.constant 0 : i32
    %c0_i32_0 = arith.constant 0 : i32
    %c0_i32_1 = arith.constant 0 : i32
    return %arg0, %c0_i32, %c0_i32_0 : i32, i32, i32
  }
}

</mosaic_0001>

<bundles_post_ra>
// kernel: tpu_custom_call.1
= control target key start
LH: loop header
LB: loop body
LE: loop exit
PB: predicated region body
PF: predicated region fallthrough
CT: control target
= control target key end

     0   :  { %8 = vsyncpa [#allocation3], 0  ;;  %s835_s0 = inlined_call_operand.vmem [shape: f32[2,8,32], index: 0, kind: input, shape index: {}]   ;;  %s836_s1 = inlined_call_operand.vmem [shape: s32[2,8,1], index: 1, kind: input, shape index: {}]   ;;  %s837_s2 = inlined_call_operand.hbm [shape: f32[32,32], index: 2, kind: input, shape index: {}]   ;;  %s838_s3 = inlined_call_operand.hbm [shape: f32[2,8,32], index: 3, kind: output, shape index: {}]  }
   0x1   :  { %9 = vsyncpa [#allocation4], 0 }
   0x2   :  { %11 = vsyncpa [#allocation4 + $0x1], 0  ;;  %s687_s12 = smov 0   ;;  %s689_s13 = smov 0  }
   0x3   :  { %s691_s14 = smov 0   ;;  %s693_s15 = smov 0  }
   0x4 LB: > { %s708_s16 = sadd.s32 4294967295, %s658_s15   ;;  %s461_s17 = sadd.s32 4294967294, %s658_s15   ;;  %s658_s15 = sphi %s693_s15, %s854_s15   ;;  %s654_s14 = sphi %s691_s14, %s853_s14   ;;  %s650_s13 = sphi %s689_s13, %s852_s13   ;;  %s646_s12 = sphi %s687_s12, %s851_s12  }
   0x5   : > { %s712_s18 = sadd.s32 1, %s658_s15   ;;  %s97_s19 = sadd.s32 1, %s654_s14 }
   0x6   : > { %s94_s20 = ssub.s32 %s658_s15, %s712_s18  ;;  %p107_p0 = scmp.ne.s32.totalorder %s654_s14, %s650_s13 }
   0x7   : > { %p95_p1 = scmp.eq.s32.totalorder %s94_s20, 0  ;;  %p108_p2 = scmp.eq.s32.totalorder %s708_s16, 1 }
   0x8   : > { %p113_p3 = scmp.ne.s32.totalorder %s650_s13, %s646_s12  ;;  %p114_p4 = scmp.eq.s32.totalorder %s461_s17, 1 }
   0x9   : > { %s723_s21 = scalar_select %p95_p1, %s654_s14, %s97_s19  }
   0xa   : > { %p725_p5 = por %p108_p2, %p107_p0  ;;  %p729_p6 = por %p114_p4, %p113_p3 }
   0xb   : > { %p462_p7 = scmp.ge.s32.totalorder %s658_s15, 1  ;;  %p121_p8 = scmp.lt.s32.totalorder %s658_s15, 3 }
   0xc   : > { %s842_s22 = scalar_select %p725_p5, 1, 0 }
   0xd   : > { %s843_s23 = scalar_select %p729_p6, 1, 0 }
   0xe   : > { %p839_p9 = scmp.eq.s32.totalorder %s708_s16, 0  ;;  %p736_p10 = pnand %p462_p7, %p121_p8 }
   0xf   : > { %s660_s25 = smov [#allocation2]   ;;  %s564_s30 = scalar_lea.hbm %s837_s2, 512 }
  0x10   : > { %s844_s24 = scalar_select %p736_p10, 1, 0 }
  0x11   : > { %s133_s26 = sshll.u32 %s660_s25, 4  ;;  %p510_p11 = pneg %p736_p10  ;;  %s134_s26 = int_to_ptr.vmem [resolvable:$true] %s133_s26 }
  0x12   : > { %p565_p13 = scmp.ne.s32.totalorder %s837_s2, %s564_s30  ;;  %p571_p3 = scmp.lt.u32.totalorder %s564_s30, %s837_s2 }
  0x13   : > { %p744_p12 = pnand %p839_p9, %p510_p11 }
  0x15   : > { %p566_p0 = pneg %p744_p12 }
  0x17   : > { %p567_p1 = pnand %p566_p0, %p565_p13 }
  0x19   : > { %p568_p2 = pneg %p567_p1 }
  0x1b   : > { %p573_p4 = pnand %p571_p3, %p568_p2 }
  0x1d   : > { %576 = shalt.err (!%p573_p4)
}
  0x1e   : > { %s577_s8 = scalar_lea.vmem %s134_s26, 512  ;;  %p585_p9 = scmp.lt.s32.totalorder %s134_s26, %s134_s26 }
  0x1f   : > { %p578_p7 = scmp.ne.s32.totalorder %s134_s26, %s577_s8  ;;  %p586_p6 = scmp.lt.s32.totalorder %s577_s8, %s577_s8 }
  0x21   : > { %p580_p8 = pnand %p578_p7, %p566_p0  ;;  %p587_p5 = por %p586_p6, %p585_p9 }
  0x23   : > { %p581_p11 = pneg %p580_p8 }
  0x25   : > { %p588_p10 = pnand %p587_p5, %p581_p11 }
  0x27   : > { %591 = shalt.err (!%p588_p10)
}
  0x28   : > { %s661_s9 = smov 128   ;;  %s662_s10 = smov 8  }
  0x29   : > { %513 = dma.hbm_to_vmem [thread:$0]  (!%p744_p12), %s837_s2, 512, %s134_s26, [#allocation3], %s661_s9, %s661_s9, %s662_s10  }
  0x2a   : > { %p846_p13 = scmp.ne.s32.totalorder %s844_s24, 0 }
  0x2b   : > { %p847_p1 = scmp.eq.s32.totalorder (!%p846_p13), %s708_s16, 0 }
  0x2c   : > { %163 = sbr.rel (%p846_p13) target bundleno = 877 (0x36d), region = 32 }
  0x33   : > { %637 = dma.done.wait (%p847_p1), [#allocation3], 512   ;;  %p848_p0 = pmov %p847_p1 }
  0x34   : > { %p190_p5 = scmp.lt.s32.totalorder %s708_s16, 1  ;;  %v663_v0 = vmov 0.0   ;;  %vm664_vm0 = vmmov 0   ;;  %v201_v1 = vld [vmem:[#allocation2] sm:$0xff]  ;;  %v202_v2 = vld [vmem:[#allocation2 + $0x8] sm:$0xff]  ;;  %v203_v3 = vld [vmem:[#allocation2 + $0x10] sm:$0xff] }
  0x35   : > { %639 = vsyncadd (%p848_p0), [#allocation3], 4294966784  ;;  %484 = vmatprep.subr.bf16.mxu0 %v663_v0  ;;  %488 = vmatprep.mubr.msk.bf16.mxu0 %vm664_vm0, %v663_v0  ;;  %v205_v4 = vpack.c.bf16 %v202_v2, %v201_v1  ;;  %v204_v5 = vld [vmem:[#allocation2 + $0x18] sm:$0xff]  ;;  %vm207_vm1 = vcmask 261120   ;;  %v665_v10 = vmov 0   ;;  %vm303_vm4 = vcmask 64512  }
  0x36   : > { %s191_s19 = scalar_select %p190_p5, %s708_s16, 1  ;;  %492 = vmatprep.subr.bf16.mxu1 %v663_v0  ;;  %494 = vmatprep.mubr.msk.bf16.mxu1 %vm664_vm0, %v663_v0  ;;  %v206_v8 = vpack.c.bf16 %v204_v5, %v203_v3  ;;  %vm317_vm5 = vcmask 1043456  }
  0x37   : > { %485 = vmatpush3.bf16.msra.mxu0 %v205_v4  ;;  %559 = vset.pattern.permute.xlu0 %v665_v10  ;;  %s187_s30 = sand.u32 1, %s650_s13   ;;  %s474_s5 = sshll.u32 %s708_s16, 7 }
  0x38   : > { %s468_s20 = sshll.u32 %s191_s19, 3  ;;  %486 = vmatprep.subr.bf16.mxu0 %v663_v0  ;;  %s467_s4 = sshll.u32 %s187_s30, 3 }
  0x39   : > { %s193_s26 = scalar_lea.vmem %s835_s0, %s468_s20  ;;  %s197_s29 = scalar_lea.vmem %s836_s1, %s468_s20 }
  0x3a   : > { %v199_v6 = vld [vmem:[%s193_s26] sm:$0xff]  ;;  %s189_s6 = scalar_lea.vmem [#allocation5], %s467_s4  ;;  %s792_s10 = scalar_lea.hbm %s838_s3, %s474_s5 }
  0x3b   : > { %v200_v7 = vpack.c.bf16 %v199_v6, %v199_v6  ;;  %487 = vmatpush3.bf16.msra.mxu0 %v206_v8  ;;  %v295_v11 = vld [vmem:[%s197_s29] sm:$0xff]  ;;  %s378_s7 = sshll.u32 %s189_s6, 4  ;;  %s365_s16 = scalar_lea.sflag [#allocation4], %s187_s30  ;;  %s794_s7 = int_to_ptr.vmem [resolvable:$true] %s378_s7 }
  0x3c   : > { %498 = vmatprep.subr.bf16.mxu0 %v663_v0  ;;  %vm296_vm2 = vcmp.ne.s32.totalorder %v295_v11, 0  ;;  %s592_s11 = scalar_lea.vmem %s794_s7, 128  ;;  %p849_p9 = scmp.ne.s32.totalorder %s842_s22, 0 }
  0x3d   : > { %v209_v9 = vsel %vm207_vm1, %v200_v7, 0  ;;  %v297_v12 = vsel %vm296_vm2, 1, %v665_v10  ;;  %v318_v25 = vsel %vm317_vm5, %v200_v7, 0  ;;  %p593_p6 = scmp.ne.s32.totalorder %s794_s7, %s592_s11  ;;  %s666_s17 = smov [#allocation5]  }
  0x3e   : > { %493 = vmatpush3.bf16.xpose.msra.mxu1 %v209_v9  ;;  %489 = vmatmul.mubr.msk.bf16.vlgmr.msra.gmra.mrb[0].mxu0 %vm207_vm1, %v200_v7  ;;  %s596_s19 = sshll.u32 %s666_s17, 4  ;;  %s597_s19 = int_to_ptr.vmem [resolvable:$false] %s596_s19 }
  0x3f   : > { %500 = vmatprep.mubr.msk.bf16.mxu0 %vm664_vm0, %v663_v0  ;;  %299 = vperm.xlu0 %559, %v297_v12   ;;  %p594_p10 = pnand %p593_p6, %p849_p9  ;;  %s598_s20 = scalar_lea.vmem %s597_s19, 256 }
  0x40   : > { %499 = vmatpush3.bf16.msra.mxu0 %v318_v25  ;;  %p599_p2 = scmp.lt.s32.totalorder %s794_s7, %s597_s19  ;;  %p600_p3 = scmp.lt.s32.totalorder %s598_s20, %s592_s11 }
  0x41   : > { %p595_p12 = pneg %p594_p10 }
  0x42   : > { %p601_p4 = por %p600_p3, %p599_p2 }
  0x44   : > { %p602_p7 = pnand %p601_p4, %p595_p12 }
  0xbe   : > { %v300_v18 = vpop.permute.xlu0 %299 }
  0xbf   : > { %vm301_vm3 = vcmp.eq.s32.totalorder %v300_v18, 1 }
 0x111   : > { %v245_v13 = vpop.f32.mrb[0].mxu0 }
 0x112   : > { %v251_v14 = vpack.c.bf16 %v245_v13, %v245_v13  ;;  %v490_v15 = vpop.f32.mrb[1].mxu0 }
 0x113   : > { %v248_v16 = vpop.f32.mrb[2].mxu0 }
 0x114   : > { %v491_v17 = vpop.f32.mrb[3].mxu0  ;;  %495 = vmatmul.mubr.msk.bf16.vlgmr.msra.gmra.mrb[0].mxu1 %vm207_vm1, %v251_v14 }
 0x1e7   : > { %v289_v19 = vpop.f32.mrb[0].mxu1 }
 0x1e8   : > { %v302_v20 = vsel %vm301_vm3, -1e+30, %v289_v19  ;;  %v496_v21 = vpop.f32.mrb[1].mxu1 }
 0x1e9   : > { %v292_v22 = vpop.f32.mrb[2].mxu1  ;;  %v304_v23 = vsel %vm303_vm4, %v302_v20, -inf }
 0x1ea   : > { %305 = vmax.xlane.f32.xlu0 %v304_v23  ;;  %v497_v24 = vpop.f32.mrb[3].mxu1 }
 0x277   : > { %v306_v26 = vpop.xlane.xlu0 %305 }
 0x278   : > { %v307_v27 = vsub.f32 %v302_v20, %v306_v26 }
 0x27a   : > { %v308_v28 = vmul.f32 1.442695, %v307_v27 }
 0x27c   : > { %560 = vpow2.f32 %v308_v28 }
 0x286   : > { %v561_v29 = vpop.eup %560 }
 0x287   : > { %v310_v30 = vsel %vm303_vm4, %v561_v29, 0.0  ;;  %v313_v31 = vpack.c.bf16 %v561_v29, %v561_v29 }
 0x288   : > { %311 = vadd.xlane.f32.xlu1 %v310_v30 }
 0x289   : > { %501 = vmatmul.mubr.msk.bf16.vlgmr.msra.gmra.mrb[4].mxu0 %vm303_vm4, %v313_v31 }
 0x315   : > { %v312_v32 = vpop.xlane.xlu1 %311 }
 0x316   : > { %562 = vrcp.f32 %v312_v32 }
 0x320   : > { %v563_v33 = vpop.eup %562 }
 0x35c   : > { %v354_v34 = vpop.f32.mrb[4].mxu0 }
 0x35d   : > { %v362_v35 = vmul.f32 %v563_v33, %v354_v34  ;;  %v502_v36 = vpop.f32.mrb[5].mxu0 }
 0x35e   : > { %v357_v37 = vpop.f32.mrb[6].mxu0 }
 0x35f   : > { %v503_v38 = vpop.f32.mrb[7].mxu0  ;;  %363 = vst.msk [vmem:[%s189_s6] sm:$0xff] %vm207_vm1, %v362_v35 }
 0x360   : > { %605 = shalt.err (!%p602_p7)
}
 0x361   : > { %s606_s24 = scalar_lea.hbm %s792_s10, 128  ;;  %s610_s27 = scalar_lea.hbm %s838_s3, 256 }
 0x362   : > { %p607_p8 = scmp.ne.s32.totalorder %s792_s10, %s606_s24  ;;  %p611_p1 = scmp.lt.u32.totalorder %s792_s10, %s838_s3 }
 0x363   : > { %p612_p0 = scmp.lt.u32.totalorder %s610_s27, %s606_s24  ;;  %p614_p6 = scmp.lt.u32.totalorder %s606_s24, %s792_s10 }
 0x364   : > { %p608_p11 = pnand %p607_p8, %p849_p9 }
 0x365   : > { %p613_p5 = por %p612_p0, %p611_p1 }
 0x366   : > { %p609_p13 = pneg %p608_p11 }
 0x367   : > { %p615_p10 = por %p614_p6, %p613_p5 }
 0x369   : > { %p616_p12 = pnand %p615_p10, %p609_p13 }
 0x36b   : > { %619 = shalt.err (!%p616_p12)
}
 0x36c   : > { %508 = dma.vmem_to_hbm [thread:$0]  (%p849_p9), %s794_s7, 128, %s792_s10, %s365_s16  }
 0x36d PF: > { %p520_p2 = scmp.ge.s32.totalorder %s658_s15, 2  ;;  %s390_s30 = sand.u32 1, %s646_s12  }
 0x36e   : > { %p850_p3 = scmp.ne.s32.totalorder %s843_s23, 0  ;;  %s391_s4 = scalar_lea.sflag [#allocation4], %s390_s30 }
 0x370   : > { %p515_p4 = pnand %p520_p2, %p850_p3 }
 0x372   : > { %641 = dma.done.wait (!%p515_p4), %s391_s4, 128  }
 0x373   : > { %643 = vsyncadd (!%p515_p4), %s391_s4, 4294967168  ;;  %p14_p7 = scmp.ge.s32.totalorder %s712_s18, 4   ;;  %s851_s12 = smov %s650_s13 }
 0x374   : > { %s852_s13 = smov %s654_s14  ;;  %s853_s14 = smov %s723_s21 }
 0x375   : > { %s854_s15 = smov %s712_s18  ;;  %16 = sbr.rel (!%p14_p7) target bundleno = 4 (0x4), region = 75 }
 0x37c   :  { %396 = vsyncpa [#allocation3], 1 }
 0x37d   :  { %398 = vsyncpa [#allocation3 + $0x1], 1 }
 0x37e   :  { %399 = vsyncpa [#allocation4], 1 }
 0x37f   :  { %401 = vsyncpa [#allocation4 + $0x1], 1 }

</bundles_post_ra>
